<compile_context>
chip_gen: v5e
topology: v5e:2x2
jax: 0.10.0
libtpu: 0.0.40
codegen_flags: <defaults>
</compile_context>

<pallas_src>
import numpy as np
import jax
import jax.numpy as jnp
from jax.experimental import pallas as pl
from jax.experimental.pallas import tpu as pltpu


def attn_decoder_kernel(
    emb_ref,     # (T_out, B, D)   decoder token embeddings, time-major
    preh_ref,    # (B, T_enc, D)   encoder hidden states
    hid0_ref,    # (B, D)          initial hidden = last valid encoder state
    cell0_ref,   # (B, D)          "random" initial cell (precomputed)
    len_ref,     # (B, 1) int32    decoder lengths
    ilen_ref,    # (B, 1) int32    encoder valid lengths
    wih_ref,     # (D, 4D)  fused LSTM input->hidden  [i|f|g|o]
    whh_ref,     # (D, 4D)  fused LSTM hidden->hidden [i|f|g|o]
    b_ref,       # (1, 4D)  fused LSTM bias (b_ih + b_hh)
    wh_ref,      # (D, D)   W_h (no bias)
    ws_ref,      # (D, D)   W_s
    bs_ref,      # (1, D)   W_s bias
    vt_ref,      # (1, D)   v_t as a row vector
    vcat_ref,    # (2D, D)  V weights, rows = [context half ; cell half]
    bv_ref,      # (1, D)   V bias
    vp_ref,      # (D, Vp)  V_prime, vocab padded to a 128 multiple
    bvp_ref,     # (1, Vp)
    out_ref,     # (T_out, B, Vp)
):
    B, T_enc, D = preh_ref.shape
    T_out = out_ref.shape[0]

    def dot(a, b):
        # default precision: single-pass bf16 MXU with f32 accumulation
        return jnp.dot(a, b, preferred_element_type=jnp.float32)

    pre = preh_ref[...]                                     # (B, T_enc, D)
    # Hoisted loop-invariant encoder projection (pre @ W_h), computed once.
    pre_wh = dot(pre.reshape(B * T_enc, D), wh_ref[...]).reshape(B, T_enc, D)

    k_idx = jax.lax.broadcasted_iota(jnp.int32, (B, T_enc), 1)
    enc_valid = k_idx < ilen_ref[...]                       # (B, T_enc)
    lengths = len_ref[...]                                  # (B, 1)

    # Hoist all weight loads out of the recurrence.
    wih = wih_ref[...]; whh = whh_ref[...]; bias = b_ref[...]
    ws = ws_ref[...]; bs = bs_ref[...]; vt_row = vt_ref[...]
    vcat = vcat_ref[...]; bv = bv_ref[...]
    vp = vp_ref[...]; bvp = bvp_ref[...]

    def step(j, carry):
        hid, cell = carry                                   # (B, D), (B, D)
        x = emb_ref[j]                                      # (B, D)

        # --- fused LSTM cell (gate order i, f, g, o) ---
        gates = dot(x, wih) + dot(hid, whh) + bias          # (B, 4D)
        ig = jax.nn.sigmoid(gates[:, 0 * D:1 * D])
        fg = jax.nn.sigmoid(gates[:, 1 * D:2 * D])
        gg = jnp.tanh(gates[:, 2 * D:3 * D])
        og = jax.nn.sigmoid(gates[:, 3 * D:4 * D])
        new_cell = fg * cell + ig * gg
        new_hid = og * jnp.tanh(new_cell)

        # --- attention: e_k = v_t . tanh(W_h pre_h[k] + W_s cell) over valid k ---
        q = dot(new_cell, ws) + bs                          # (B, D)
        keys = jnp.tanh(pre_wh + q[:, None, :])             # (B, T_enc, D)
        e = jnp.sum(keys * vt_row[None, :, :], axis=-1)     # (B, T_enc) VPU+XLU
        e = jnp.where(enc_valid, e, -1e30)
        m = jnp.max(e, axis=-1, keepdims=True)
        p = jnp.exp(e - m)
        p = jnp.where(enc_valid, p, 0.0)
        a = p / jnp.sum(p, axis=-1, keepdims=True)
        context = jnp.sum(a[:, :, None] * pre, axis=1)      # (B, D)

        # --- out = V_prime(V(cat(context, cell))) ---
        v_in = jnp.concatenate([context, new_cell], axis=-1)  # (B, 2D)
        v_out = dot(v_in, vcat) + bv                           # (B, D)
        logits = dot(v_out, vp) + bvp                          # (B, Vp)
        logits = jnp.where(j < lengths, logits, 0.0)           # pad_sequence zeros
        out_ref[j] = logits
        return (new_hid, new_cell)

    jax.lax.fori_loop(0, T_out, step, (hid0_ref[...], cell0_ref[...]))


def init_params(key, dict_size, dim):
    keys = jax.random.split(key, 24)

    def u(k, shape, scale):
        return jax.random.uniform(k, shape, jnp.float32, -scale, scale)

    s = 1.0 / np.sqrt(dim)
    s2 = 1.0 / np.sqrt(2 * dim)
    p = {"embedding": u(keys[0], (dict_size, dim), 1.0)}
    for n, k in zip(["wih_i", "wih_f", "wih_g", "wih_o",
                     "whh_i", "whh_f", "whh_g", "whh_o"], keys[1:9]):
        p[n] = u(k, (dim, dim), s)
    for n, k in zip(["b_i", "b_f", "b_g", "b_o"], keys[9:13]):
        p[n] = u(k, (1, dim), s)          # b_ih + b_hh folded together
    p["wh"] = u(keys[13], (dim, dim), s)          # W_h (no bias)
    p["ws"] = u(keys[14], (dim, dim), s)          # W_s
    p["bs"] = u(keys[15], (1, dim), s)            # W_s bias
    p["vt"] = u(keys[16], (dim, 1), s)            # v_t (no bias)
    p["vc"] = u(keys[17], (dim, dim), s2)         # V[:, :dim]   (context half)
    p["vcell"] = u(keys[18], (dim, dim), s2)      # V[:, dim:]   (cell half)
    p["bv"] = u(keys[19], (1, dim), s2)
    p["vp"] = u(keys[20], (dim, dict_size), s)    # V_prime
    p["bvp"] = u(keys[21], (1, dict_size), s)
    return p


def attn_decoder_forward(params, words, lengths, pre_h, input_len, cell_init):
    B, T_dec = words.shape
    T_enc, _, D = pre_h.shape
    V = params["vp"].shape[1]
    V_pad = int(-(-V // 128) * 128)                # lane-dense logits stores

    lengths = lengths.astype(jnp.int32)
    input_len = input_len.astype(jnp.int32)
    t_out = int(np.max(np.asarray(lengths)))       # pad_sequence output length

    # glue: embedding gather (time-major), initial-hidden gather, weight packing
    emb_t = jnp.transpose(params["embedding"][words], (1, 0, 2))[:t_out]   # (t_out,B,D)
    preh_b = jnp.transpose(pre_h, (1, 0, 2))                               # (B,T_enc,D)
    hid0 = preh_b[jnp.arange(B), jnp.maximum(input_len - 1, 0), :]         # (B,D)
    cell0 = cell_init.reshape(B, D)

    wih_all = jnp.concatenate(
        [params[n] for n in ("wih_i", "wih_f", "wih_g", "wih_o")], axis=1)  # (D,4D)
    whh_all = jnp.concatenate(
        [params[n] for n in ("whh_i", "whh_f", "whh_g", "whh_o")], axis=1)  # (D,4D)
    b_all = jnp.concatenate(
        [params[n] for n in ("b_i", "b_f", "b_g", "b_o")], axis=1)          # (1,4D)
    vcat = jnp.concatenate([params["vc"], params["vcell"]], axis=0)         # (2D,D)
    vt_row = params["vt"].T                                                 # (1,D)
    vp_pad = jnp.pad(params["vp"], ((0, 0), (0, V_pad - V)))
    bvp_pad = jnp.pad(params["bvp"], ((0, 0), (0, V_pad - V)))

    # Whole problem fits in VMEM at these sizes: single kernel invocation, no
    # grid (so no redundant weight double-buffering), all matmuls batched over B.
    # TODO(synk): for production vocab sizes, tile V_prime / the output along V.
    out = pl.pallas_call(
        attn_decoder_kernel,
        out_shape=jax.ShapeDtypeStruct((t_out, B, V_pad), jnp.float32),
        compiler_params=pltpu.CompilerParams(vmem_limit_bytes=32 * 1024 * 1024),
    )(emb_t, preh_b, hid0, cell0,
      lengths.reshape(B, 1), input_len.reshape(B, 1),
      wih_all, whh_all, b_all,
      params["wh"], params["ws"], params["bs"], vt_row,
      vcat, params["bv"], vp_pad, bvp_pad)

    return out[:, :, :V]                            # (t_out, B, V), seq-first


def ref_forward(params, words, lengths, pre_h, input_len, cell_init):
    p = {k: np.asarray(v, np.float32) for k, v in params.items()}
    words = np.asarray(words); lengths = np.asarray(lengths)
    pre_h = np.asarray(pre_h, np.float32); input_len = np.asarray(input_len)
    cell_init = np.asarray(cell_init, np.float32)
    B, _ = words.shape
    Vsz = p["vp"].shape[1]
    t_out = int(lengths.max())
    out = np.zeros((t_out, B, Vsz), np.float32)

    def sig(x):
        return 1.0 / (1.0 + np.exp(-x))

    for i in range(B):
        emb = p["embedding"][words[i]]
        hid = pre_h[int(input_len[i]) - 1, i, :][None]
        cell = cell_init[i][None]
        for j in range(int(lengths[i])):
            x = emb[j:j + 1]
            ig = sig(x @ p["wih_i"] + hid @ p["whh_i"] + p["b_i"])
            fg = sig(x @ p["wih_f"] + hid @ p["whh_f"] + p["b_f"])
            gg = np.tanh(x @ p["wih_g"] + hid @ p["whh_g"] + p["b_g"])
            og = sig(x @ p["wih_o"] + hid @ p["whh_o"] + p["b_o"])
            cell = fg * cell + ig * gg
            hid = og * np.tanh(cell)
            IL = int(input_len[i])
            pre = pre_h[:IL, i, :]
            e = np.tanh(pre @ p["wh"] + (cell @ p["ws"] + p["bs"])) @ p["vt"]
            e = e - e.max()
            a = np.exp(e) / np.exp(e).sum()
            context = (a * pre).sum(0, keepdims=True)
            v_out = context @ p["vc"] + cell @ p["vcell"] + p["bv"]
            out[j, i, :] = (v_out @ p["vp"] + p["bvp"])[0]
    return out


if __name__ == "__main__":
    B, T_dec, T_enc, D, VOCAB = 2, 8, 8, 32, 64   # dim = args.dim * 2 (bidir) = 32
    key = jax.random.PRNGKey(0)
    k1, k2, k3, k4 = jax.random.split(key, 4)

    params = init_params(k1, VOCAB, D)
    words = jax.random.randint(k2, (B, T_dec), 0, VOCAB, dtype=jnp.int32)
    lengths = jnp.array([8, 5], dtype=jnp.int32)
    input_len = jnp.array([8, 6], dtype=jnp.int32)
    pre_h = jax.random.normal(k3, (T_enc, B, D), jnp.float32)
    # PyTorch draws torch.randn((1, dim)) for the initial cell per batch element;
    # here it is drawn deterministically once and passed in.
    cell_init = jax.random.normal(k4, (B, D), jnp.float32)

    out = attn_decoder_forward(params, words, lengths, pre_h, input_len, cell_init)
    out = jax.block_until_ready(out)

    ref = ref_forward(params, words, lengths, pre_h, input_len, cell_init)
    # Tolerance reflects default (single-pass bf16 MXU, f32 accumulation) matmul
    # precision compounded over the 8-step recurrence (was Precision.HIGHEST).
    np.testing.assert_allclose(np.asarray(out), ref, rtol=2e-2, atol=2e-2)
    # TODO(synk): serial() greedy decode (topk + EOS-dependent loop length) has no
    # static-shape Pallas equivalent and is not part of forward(); not implemented.
    print("KERNEL_OK")
</pallas_src>

<mosaic_0001>
module attributes {stable_mosaic.version = 11 : i64} {
  func.func @attn_decoder_kernel(%arg0: memref<8x2x32xf32, #tpu.memory_space<vmem>>, %arg1: memref<2x8x32xf32, #tpu.memory_space<vmem>>, %arg2: memref<2x32xf32, #tpu.memory_space<vmem>>, %arg3: memref<2x32xf32, #tpu.memory_space<vmem>>, %arg4: memref<2x1xi32, #tpu.memory_space<vmem>>, %arg5: memref<2x1xi32, #tpu.memory_space<vmem>>, %arg6: memref<32x128xf32, #tpu.memory_space<vmem>>, %arg7: memref<32x128xf32, #tpu.memory_space<vmem>>, %arg8: memref<1x128xf32, #tpu.memory_space<vmem>>, %arg9: memref<32x32xf32, #tpu.memory_space<vmem>>, %arg10: memref<32x32xf32, #tpu.memory_space<vmem>>, %arg11: memref<1x32xf32, #tpu.memory_space<vmem>>, %arg12: memref<1x32xf32, #tpu.memory_space<vmem>>, %arg13: memref<64x32xf32, #tpu.memory_space<vmem>>, %arg14: memref<1x32xf32, #tpu.memory_space<vmem>>, %arg15: memref<32x128xf32, #tpu.memory_space<vmem>>, %arg16: memref<1x128xf32, #tpu.memory_space<vmem>>, %arg17: memref<8x2x128xf32, #tpu.memory_space<vmem>>) attributes {dimension_semantics = [], scalar_prefetch = 0 : i64, scratch_operands = 0 : i64, tpu.core_type = #tpu.core_type<tc>} {
    %c0 = arith.constant 0 : index
    %c0_0 = arith.constant 0 : index
    %c0_1 = arith.constant 0 : index
    %0 = vector.load %arg1[%c0, %c0_0, %c0_1] : memref<2x8x32xf32, #tpu.memory_space<vmem>>, vector<2x8x32xf32>
    %1 = vector.shape_cast %0 : vector<2x8x32xf32> to vector<16x32xf32>
    %c0_2 = arith.constant 0 : index
    %c0_3 = arith.constant 0 : index
    %2 = vector.load %arg9[%c0_2, %c0_3] : memref<32x32xf32, #tpu.memory_space<vmem>>, vector<32x32xf32>
    %cst = arith.constant dense<0.000000e+00> : vector<16x32xf32>
    %3 = tpu.matmul %1, %2, %cst {dimension_numbers = #tpu.dot_dimension_numbers<[1], [0], [0], [1], [0, 0, 1, 1], [], []>} : vector<16x32xf32>, vector<32x32xf32>, vector<16x32xf32> -> vector<16x32xf32>
    %4 = vector.shape_cast %3 : vector<16x32xf32> to vector<2x8x32xf32>
    %5 = tpu.iota {dimensions = array<i32: 1>} : vector<2x8xi32>
    %c0_4 = arith.constant 0 : index
    %c0_5 = arith.constant 0 : index
    %6 = vector.load %arg5[%c0_4, %c0_5] : memref<2x1xi32, #tpu.memory_space<vmem>>, vector<2x1xi32>
    %7 = vector.broadcast %6 : vector<2x1xi32> to vector<2x8xi32>
    %8 = arith.cmpi slt, %5, %7 : vector<2x8xi32>
    %c0_6 = arith.constant 0 : index
    %c0_7 = arith.constant 0 : index
    %9 = vector.load %arg4[%c0_6, %c0_7] : memref<2x1xi32, #tpu.memory_space<vmem>>, vector<2x1xi32>
    %c0_8 = arith.constant 0 : index
    %c0_9 = arith.constant 0 : index
    %10 = vector.load %arg6[%c0_8, %c0_9] : memref<32x128xf32, #tpu.memory_space<vmem>>, vector<32x128xf32>
    %c0_10 = arith.constant 0 : index
    %c0_11 = arith.constant 0 : index
    %11 = vector.load %arg7[%c0_10, %c0_11] : memref<32x128xf32, #tpu.memory_space<vmem>>, vector<32x128xf32>
    %c0_12 = arith.constant 0 : index
    %c0_13 = arith.constant 0 : index
    %12 = vector.load %arg8[%c0_12, %c0_13] : memref<1x128xf32, #tpu.memory_space<vmem>>, vector<1x128xf32>
    %c0_14 = arith.constant 0 : index
    %c0_15 = arith.constant 0 : index
    %13 = vector.load %arg10[%c0_14, %c0_15] : memref<32x32xf32, #tpu.memory_space<vmem>>, vector<32x32xf32>
    %c0_16 = arith.constant 0 : index
    %c0_17 = arith.constant 0 : index
    %14 = vector.load %arg11[%c0_16, %c0_17] : memref<1x32xf32, #tpu.memory_space<vmem>>, vector<1x32xf32>
    %c0_18 = arith.constant 0 : index
    %c0_19 = arith.constant 0 : index
    %15 = vector.load %arg12[%c0_18, %c0_19] : memref<1x32xf32, #tpu.memory_space<vmem>>, vector<1x32xf32>
    %c0_20 = arith.constant 0 : index
    %c0_21 = arith.constant 0 : index
    %16 = vector.load %arg13[%c0_20, %c0_21] : memref<64x32xf32, #tpu.memory_space<vmem>>, vector<64x32xf32>
    %c0_22 = arith.constant 0 : index
    %c0_23 = arith.constant 0 : index
    %17 = vector.load %arg14[%c0_22, %c0_23] : memref<1x32xf32, #tpu.memory_space<vmem>>, vector<1x32xf32>
    %c0_24 = arith.constant 0 : index
    %c0_25 = arith.constant 0 : index
    %18 = vector.load %arg15[%c0_24, %c0_25] : memref<32x128xf32, #tpu.memory_space<vmem>>, vector<32x128xf32>
    %c0_26 = arith.constant 0 : index
    %c0_27 = arith.constant 0 : index
    %19 = vector.load %arg16[%c0_26, %c0_27] : memref<1x128xf32, #tpu.memory_space<vmem>>, vector<1x128xf32>
    %c0_28 = arith.constant 0 : index
    %c0_29 = arith.constant 0 : index
    %20 = vector.load %arg2[%c0_28, %c0_29] : memref<2x32xf32, #tpu.memory_space<vmem>>, vector<2x32xf32>
    %c0_30 = arith.constant 0 : index
    %c0_31 = arith.constant 0 : index
    %21 = vector.load %arg3[%c0_30, %c0_31] : memref<2x32xf32, #tpu.memory_space<vmem>>, vector<2x32xf32>
    %c0_i32 = arith.constant 0 : i32
    %c8_i32 = arith.constant 8 : i32
    %22 = arith.addi %c0_i32, %c8_i32 : i32
    %c1_i32 = arith.constant 1 : i32
    %23:2 = scf.for %arg18 = %c0_i32 to %22 step %c1_i32 iter_args(%arg19 = %20, %arg20 = %21) -> (vector<2x32xf32>, vector<2x32xf32>)  : i32 {
      %24 = arith.index_cast %arg18 : i32 to index
      %c0_33 = arith.constant 0 : index
      %c0_34 = arith.constant 0 : index
      %25 = vector.load %arg0[%24, %c0_33, %c0_34] : memref<8x2x32xf32, #tpu.memory_space<vmem>>, vector<1x2x32xf32>
      %26 = vector.shape_cast %25 : vector<1x2x32xf32> to vector<2x32xf32>
      %cst_35 = arith.constant dense<0.000000e+00> : vector<2x128xf32>
      %27 = tpu.matmul %26, %10, %cst_35 {dimension_numbers = #tpu.dot_dimension_numbers<[1], [0], [0], [1], [0, 0, 1, 1], [], []>} : vector<2x32xf32>, vector<32x128xf32>, vector<2x128xf32> -> vector<2x128xf32>
      %cst_36 = arith.constant dense<0.000000e+00> : vector<2x128xf32>
      %28 = tpu.matmul %arg19, %11, %cst_36 {dimension_numbers = #tpu.dot_dimension_numbers<[1], [0], [0], [1], [0, 0, 1, 1], [], []>} : vector<2x32xf32>, vector<32x128xf32>, vector<2x128xf32> -> vector<2x128xf32>
      %29 = arith.addf %27, %28 : vector<2x128xf32>
      %30 = vector.broadcast %12 : vector<1x128xf32> to vector<2x128xf32>
      %31 = arith.addf %29, %30 : vector<2x128xf32>
      %32 = vector.extract_strided_slice %31 {offsets = [0, 0], sizes = [2, 32], strides = [1, 1]} : vector<2x128xf32> to vector<2x32xf32>
      %33 = arith.negf %32 : vector<2x32xf32>
      %34 = math.exp %33 : vector<2x32xf32>
      %cst_37 = arith.constant 1.000000e+00 : f32
      %35 = vector.broadcast %cst_37 : f32 to vector<2x32xf32>
      %36 = arith.addf %35, %34 : vector<2x32xf32>
      %37 = arith.divf %35, %36 : vector<2x32xf32>
      %38 = vector.extract_strided_slice %31 {offsets = [0, 32], sizes = [2, 32], strides = [1, 1]} : vector<2x128xf32> to vector<2x32xf32>
      %39 = arith.negf %38 : vector<2x32xf32>
      %40 = math.exp %39 : vector<2x32xf32>
      %cst_38 = arith.constant 1.000000e+00 : f32
      %41 = vector.broadcast %cst_38 : f32 to vector<2x32xf32>
      %42 = arith.addf %41, %40 : vector<2x32xf32>
      %43 = arith.divf %41, %42 : vector<2x32xf32>
      %44 = vector.extract_strided_slice %31 {offsets = [0, 64], sizes = [2, 32], strides = [1, 1]} : vector<2x128xf32> to vector<2x32xf32>
      %45 = math.tanh %44 : vector<2x32xf32>
      %46 = vector.extract_strided_slice %31 {offsets = [0, 96], sizes = [2, 32], strides = [1, 1]} : vector<2x128xf32> to vector<2x32xf32>
      %47 = arith.negf %46 : vector<2x32xf32>
      %48 = math.exp %47 : vector<2x32xf32>
      %cst_39 = arith.constant 1.000000e+00 : f32
      %49 = vector.broadcast %cst_39 : f32 to vector<2x32xf32>
      %50 = arith.addf %49, %48 : vector<2x32xf32>
      %51 = arith.divf %49, %50 : vector<2x32xf32>
      %52 = arith.mulf %43, %arg20 : vector<2x32xf32>
      %53 = arith.mulf %37, %45 : vector<2x32xf32>
      %54 = arith.addf %52, %53 : vector<2x32xf32>
      %55 = math.tanh %54 : vector<2x32xf32>
      %56 = arith.mulf %51, %55 : vector<2x32xf32>
      %cst_40 = arith.constant dense<0.000000e+00> : vector<2x32xf32>
      %57 = tpu.matmul %54, %13, %cst_40 {dimension_numbers = #tpu.dot_dimension_numbers<[1], [0], [0], [1], [0, 0, 1, 1], [], []>} : vector<2x32xf32>, vector<32x32xf32>, vector<2x32xf32> -> vector<2x32xf32>
      %58 = vector.broadcast %14 : vector<1x32xf32> to vector<2x32xf32>
      %59 = arith.addf %57, %58 : vector<2x32xf32>
      %60 = vector.shape_cast %59 : vector<2x32xf32> to vector<2x1x32xf32>
      %61 = vector.broadcast %60 : vector<2x1x32xf32> to vector<2x8x32xf32>
      %62 = arith.addf %4, %61 : vector<2x8x32xf32>
      %63 = math.tanh %62 : vector<2x8x32xf32>
      %64 = vector.shape_cast %15 : vector<1x32xf32> to vector<1x1x32xf32>
      %65 = vector.broadcast %64 : vector<1x1x32xf32> to vector<2x8x32xf32>
      %66 = arith.mulf %63, %65 : vector<2x8x32xf32>
      %cst_41 = arith.constant dense<0.000000e+00> : vector<2x8xf32>
      %67 = vector.multi_reduction <add>, %66, %cst_41 [2] : vector<2x8x32xf32> to vector<2x8xf32>
      %cst_42 = arith.constant -1.000000e+30 : f32
      %68 = vector.broadcast %cst_42 : f32 to vector<2x8xf32>
      %69 = arith.select %8, %67, %68 : vector<2x8xi1>, vector<2x8xf32>
      %cst_43 = arith.constant dense<0xFF800000> : vector<2xf32>
      %70 = vector.multi_reduction <maximumf>, %69, %cst_43 [1] : vector<2x8xf32> to vector<2xf32>
      %71 = vector.shape_cast %70 : vector<2xf32> to vector<2x1xf32>
      %72 = vector.broadcast %71 : vector<2x1xf32> to vector<2x8xf32>
      %73 = arith.subf %69, %72 : vector<2x8xf32>
      %74 = math.exp %73 : vector<2x8xf32>
      %cst_44 = arith.constant 0.000000e+00 : f32
      %75 = vector.broadcast %cst_44 : f32 to vector<2x8xf32>
      %76 = arith.select %8, %74, %75 : vector<2x8xi1>, vector<2x8xf32>
      %cst_45 = arith.constant dense<0.000000e+00> : vector<2xf32>
      %77 = vector.multi_reduction <add>, %76, %cst_45 [1] : vector<2x8xf32> to vector<2xf32>
      %78 = vector.shape_cast %77 : vector<2xf32> to vector<2x1xf32>
      %79 = vector.broadcast %78 : vector<2x1xf32> to vector<2x8xf32>
      %80 = arith.divf %76, %79 : vector<2x8xf32>
      %81 = vector.shape_cast %80 : vector<2x8xf32> to vector<2x8x1xf32>
      %82 = vector.broadcast %81 : vector<2x8x1xf32> to vector<2x8x32xf32>
      %83 = arith.mulf %82, %0 : vector<2x8x32xf32>
      %cst_46 = arith.constant dense<0.000000e+00> : vector<2x32xf32>
      %84 = vector.multi_reduction <add>, %83, %cst_46 [1] : vector<2x8x32xf32> to vector<2x32xf32>
      %85 = tpu.concatenate %84, %54 in 1 : vector<2x32xf32>, vector<2x32xf32> -> vector<2x64xf32>
      %cst_47 = arith.constant dense<0.000000e+00> : vector<2x32xf32>
      %86 = tpu.matmul %85, %16, %cst_47 {dimension_numbers = #tpu.dot_dimension_numbers<[1], [0], [0], [1], [0, 0, 1, 1], [], []>} : vector<2x64xf32>, vector<64x32xf32>, vector<2x32xf32> -> vector<2x32xf32>
      %87 = vector.broadcast %17 : vector<1x32xf32> to vector<2x32xf32>
      %88 = arith.addf %86, %87 : vector<2x32xf32>
      %cst_48 = arith.constant dense<0.000000e+00> : vector<2x128xf32>
      %89 = tpu.matmul %88, %18, %cst_48 {dimension_numbers = #tpu.dot_dimension_numbers<[1], [0], [0], [1], [0, 0, 1, 1], [], []>} : vector<2x32xf32>, vector<32x128xf32>, vector<2x128xf32> -> vector<2x128xf32>
      %90 = vector.broadcast %19 : vector<1x128xf32> to vector<2x128xf32>
      %91 = arith.addf %89, %90 : vector<2x128xf32>
      %92 = vector.broadcast %arg18 : i32 to vector<2x1xi32>
      %93 = arith.cmpi slt, %92, %9 : vector<2x1xi32>
      %cst_49 = arith.constant 0.000000e+00 : f32
      %94 = vector.shape_cast %93 : vector<2x1xi1> to vector<2x1xi1>
      %95 = vector.broadcast %94 : vector<2x1xi1> to vector<2x128xi1>
      %96 = vector.broadcast %cst_49 : f32 to vector<2x128xf32>
      %97 = arith.select %95, %91, %96 : vector<2x128xi1>, vector<2x128xf32>
      %98 = arith.index_cast %arg18 : i32 to index
      %c0_50 = arith.constant 0 : index
      %c0_51 = arith.constant 0 : index
      %99 = vector.load %arg17[%98, %c0_50, %c0_51] : memref<8x2x128xf32, #tpu.memory_space<vmem>>, vector<1x2x128xf32>
      %100 = vector.shape_cast %99 : vector<1x2x128xf32> to vector<2x128xf32>
      %101 = vector.shape_cast %97 : vector<2x128xf32> to vector<1x2x128xf32>
      tpu.vector_store %arg17[%98, %c0_50, %c0_51], %101 {strides = array<i32>} : memref<8x2x128xf32, #tpu.memory_space<vmem>>, vector<1x2x128xf32>,
      scf.yield %56, %54 : vector<2x32xf32>, vector<2x32xf32>
    }
    %c8_i32_32 = arith.constant 8 : i32
    return
  }
}

</mosaic_0001>

<bundles_post_ra>
// kernel: tpu_custom_call.1
= control target key start
LH: loop header
LB: loop body
LE: loop exit
PB: predicated region body
PF: predicated region fallthrough
CT: control target
= control target key end

     0   :  { %s1130_s0 = inlined_call_operand.hbm [shape: f32[8,2,32], index: 0, kind: input, shape index: {}]   ;;  %s1131_s1 = inlined_call_operand.hbm [shape: f32[2,8,32], index: 1, kind: input, shape index: {}]   ;;  %s1132_s2 = inlined_call_operand.vmem [shape: f32[2,32], index: 2, kind: input, shape index: {}]   ;;  %s1133_s3 = inlined_call_operand.vmem [shape: f32[2,32], index: 3, kind: input, shape index: {}]   ;;  %s1134_s4 = inlined_call_operand.vmem [shape: s32[2,1], index: 4, kind: input, shape index: {}]   ;;  %s1135_s5 = inlined_call_operand.vmem [shape: s32[2,1], index: 5, kind: input, shape index: {}]   ;;  %s1136_s6 = inlined_call_operand.vmem [shape: f32[32,128], index: 6, kind: input, shape index: {}]   ;;  %s1137_s7 = inlined_call_operand.vmem [shape: f32[32,128], index: 7, kind: input, shape index: {}]   ;;  %s1138_s8 = inlined_call_operand.vmem [shape: f32[1,128], index: 8, kind: input, shape index: {}]   ;;  %s1139_s9 = inlined_call_operand.vmem [shape: f32[32,32], index: 9, kind: input, shape index: {}]   ;;  %s1140_s10 = inlined_call_operand.hbm [shape: f32[32,32], index: 10, kind: input, shape index: {}]   ;;  %s1141_s11 = inlined_call_operand.vmem [shape: f32[1,32], index: 11, kind: input, shape index: {}]   ;;  %s1142_s12 = inlined_call_operand.vmem [shape: f32[1,32], index: 12, kind: input, shape index: {}]   ;;  %s1143_s13 = inlined_call_operand.vmem [shape: f32[64,32], index: 13, kind: input, shape index: {}]   ;;  %s1144_s14 = inlined_call_operand.vmem [shape: f32[1,32], index: 14, kind: input, shape index: {}]   ;;  %s1145_s15 = inlined_call_operand.hbm [shape: f32[32,128], index: 15, kind: input, shape index: {}]   ;;  %s1146_s16 = inlined_call_operand.vmem [shape: f32[1,128], index: 16, kind: input, shape index: {}]   ;;  %s1147_s17 = inlined_call_operand.hbm [shape: f32[8,2,128], index: 17, kind: output, shape index: {}]  }
   0x1   :  { %1148 = sst [smem:[#allocation15_spill]] %s1130_s0 }
   0x2   :  { %1149 = sst [smem:[#allocation16_spill]] %s1131_s1 }
   0x3   :  { %1150 = sst [smem:[#allocation17_spill]] %s1147_s17 }
   0x4   :  { %22 = vsyncpa [#allocation3], 0 }
   0x5   :  { %23 = vsyncpa [#allocation6], 0 }
   0x6   :  { %24 = vsyncpa [#allocation9], 0  ;;  %s1151_s26 = sld [smem:[#allocation16_spill]] }
   0xc   :  { %s43_s27 = sshll.u32 %s1151_s26, 4  ;;  %s44_s27 = int_to_ptr.hbm [resolvable:$true] %s43_s27 }
   0xd   :  { %25 = vsyncpa [#allocation4], 0  ;;  %s742_s28 = smov [#allocation5]   ;;  %s1152_s18 = sld [smem:[#allocation15_spill]] }
   0xe   :  { %s45_s29 = sshll.u32 %s742_s28, 4  ;;  %s743_s1 = smov 128   ;;  %s46_s29 = int_to_ptr.vmem [resolvable:$true] %s45_s29 }
   0xf   :  { %s744_s20 = smov 8   ;;  %s745_s21 = smov [#allocation2]  }
  0x10   :  { %51 = dma.hbm_to_vmem [thread:$0]  %s44_s27, 256, %s46_s29, [#allocation6], %s743_s1, %s743_s1, %s744_s20  }
  0x11   :  { %s32_s22 = sshll.u32 %s745_s21, 4  ;;  %s746_s23 = smov 32   ;;  %s33_s22 = int_to_ptr.vmem [resolvable:$true] %s32_s22 }
  0x12   :  { %s747_s17 = smov 2   ;;  %s72_s26 = sshll.u32 %s1140_s10, 4  ;;  %s73_s26 = int_to_ptr.hbm [resolvable:$true] %s72_s26 }
  0x13   :  { %s30_s19 = sshll.u32 %s1152_s18, 4  ;;  %s748_s28 = smov [#allocation7]   ;;  %s31_s19 = int_to_ptr.hbm [resolvable:$true] %s30_s19 }
  0x14   :  { %38 = dma.hbm_to_vmem [thread:$0]  %s31_s19, 256, %s33_s22, [#allocation3], %s746_s23, %s746_s23, %s747_s17  }
  0x15   :  { %s74_s0 = sshll.u32 %s748_s28, 4  ;;  %s93_s29 = sshll.u32 %s1145_s15, 4  ;;  %s75_s0 = int_to_ptr.vmem [resolvable:$true] %s74_s0  ;;  %s94_s29 = int_to_ptr.hbm [resolvable:$true] %s93_s29 }
  0x16   :  { %80 = dma.hbm_to_vmem [thread:$0]  %s73_s26, 512, %s75_s0, [#allocation6], %s743_s1, %s743_s1, %s744_s20  }
  0x17   :  { %s749_s18 = smov [#allocation8]  }
  0x18   :  { %s95_s21 = sshll.u32 %s749_s18, 4  ;;  %s96_s21 = int_to_ptr.vmem [resolvable:$true] %s95_s21 }
  0x19   :  { %101 = dma.hbm_to_vmem [thread:$0]  %s94_s29, 512, %s96_s21, [#allocation9], %s743_s1, %s743_s1, %s744_s20  }
  0x1a   :  { %722 = dma.done.wait [#allocation3], 256  }
  0x1b   :  { %723 = vsyncadd [#allocation3], 4294967040 }
  0x1c   :  { %724 = dma.done.wait [#allocation6], 768  }
  0x1d   :  { %725 = vsyncadd [#allocation6], 4294966528 }
  0x1e   :  { %726 = dma.done.wait [#allocation9], 512  }
  0x1f   :  { %727 = vsyncadd [#allocation9], 4294966784  ;;  %v750_v0 = vmov 0   ;;  %v864_v1 = vld [vmem:[%s1134_s4] sm:$0x3]  ;;  %v874_v3 = vld [vmem:[%s1136_s6 + $0x8] sm:$0xff]  ;;  %v156_v40 = vlaneseq }
  0x20   :  { %570 = vset.pattern.permute.xlu0 %v750_v0  ;;  %v869_v2 = vld [vmem:[%s1136_s6] sm:$0xff]  ;;  %v879_v4 = vld [vmem:[%s1136_s6 + $0x10] sm:$0xff]  ;;  %v884_v5 = vld [vmem:[%s1136_s6 + $0x18] sm:$0xff]  ;;  %vm126_vm0 = vcmask 261120  }
  0x21   :  { %v889_v6 = vld [vmem:[%s1137_s7] sm:$0xff]  ;;  %v894_v7 = vld [vmem:[%s1137_s7 + $0x8] sm:$0xff]  ;;  %v899_v8 = vld [vmem:[%s1137_s7 + $0x10] sm:$0xff]  ;;  %v1017_v41 = vand.u32 127, %v156_v40 }
  0x22   :  { %v904_v9 = vld [vmem:[%s1137_s7 + $0x18] sm:$0xff]  ;;  %v909_v10 = vld [vmem:[%s1138_s8] sm:$0x1]  ;;  %v913_v12 = vld [vmem:[#allocation7 + $0x8] sm:$0xff] }
  0x23   :  { %v911_v11 = vld [vmem:[#allocation7] sm:$0xff]  ;;  %v915_v13 = vld [vmem:[#allocation7 + $0x10] sm:$0xff]  ;;  %v917_v14 = vld [vmem:[#allocation7 + $0x18] sm:$0xff] }
  0x24   :  { %v922_v15 = vld [vmem:[%s1141_s11] sm:$0x1]  ;;  %v937_v18 = vld [vmem:[%s1143_s13 + $0x8] sm:$0xff]  ;;  %v942_v19 = vld [vmem:[%s1143_s13 + $0x10] sm:$0xff] }
  0x25   :  { %v927_v16 = vld [vmem:[%s1142_s12] sm:$0x1]  ;;  %v947_v20 = vld [vmem:[%s1143_s13 + $0x18] sm:$0xff]  ;;  %v957_v22 = vld [vmem:[%s1143_s13 + $0x28] sm:$0xff] }
  0x26   :  { %v932_v17 = vld [vmem:[%s1143_s13] sm:$0xff]  ;;  %v962_v23 = vld [vmem:[%s1143_s13 + $0x30] sm:$0xff]  ;;  %v967_v24 = vld [vmem:[%s1143_s13 + $0x38] sm:$0xff] }
  0x27   :  { %v952_v21 = vld [vmem:[%s1143_s13 + $0x20] sm:$0xff]  ;;  %v976_v27 = vld [vmem:[#allocation8 + $0x8] sm:$0xff]  ;;  %v978_v28 = vld [vmem:[#allocation8 + $0x10] sm:$0xff] }
  0x28   :  { %v972_v25 = vld [vmem:[%s1144_s14] sm:$0x1]  ;;  %v980_v29 = vld [vmem:[#allocation8 + $0x18] sm:$0xff]  ;;  %v124_v34 = vld [vmem:[%s1139_s9 + $0x10] sm:$0xff] }
  0x29   :  { %v974_v26 = vld [vmem:[#allocation8] sm:$0xff]  ;;  %v125_v33 = vld [vmem:[%s1139_s9 + $0x18] sm:$0xff]  ;;  %v123_v35 = vld [vmem:[%s1139_s9 + $0x8] sm:$0xff] }
  0x2a   :  { %v985_v30 = vld [vmem:[%s1146_s16] sm:$0x1]  ;;  %145 = vmatpush.msra.mxu0 %v125_v33  ;;  %528 = vmatpush.msra.mxu1 %v125_v33  ;;  %v1008_v38 = vld [vmem:[#allocation5] sm:$0xff]  ;;  %v1010_v39 = vld [vmem:[#allocation5 + $0x8] sm:$0xff] }
  0x2b   :  { %v193_v31 = vld [vmem:[%s1132_s2] sm:$0x3]  }
  0x2c   :  { %v194_v32 = vld [vmem:[%s1133_s3] sm:$0x3]   ;;  %146 = vmatpush.msra.mxu0 %v124_v34  ;;  %529 = vmatpush.msra.mxu1 %v124_v34 }
  0x2d   :  { %v158_v36 = vld [vmem:[%s1135_s5] sm:$0x3]  ;;  %s1031_s5 = smov 0  }
  0x2e   :  { %v122_v37 = vld [vmem:[%s1139_s9] sm:$0xff]  ;;  %160 = vperm.xlu0 %570, %v158_v36   ;;  %147 = vmatpush.msra.mxu0 %v123_v35 }
  0x2f   :  { %530 = vmatpush.msra.mxu1 %v123_v35 }
  0x30   :  { %148 = vmatpush.msra.mxu0 %v122_v37 }
  0x31   :  { %531 = vmatpush.msra.mxu1 %v122_v37  ;;  %519 = vmatmul.msk.f32.vlgmr.msra.gmra.mxu0 %vm126_vm0, %v1008_v38 }
  0x32   :  { %520 = vmatmul.msk.f32.vlgmr.msra.gmra.mxu1 %vm126_vm0, %v1010_v39 }
  0xa0   :  { %v1019_v42 = vpop.permute.xlu0 %160 }
  0xa1   :  { %vm162_vm1 = vcmp.lt.s32.totalorder %v1017_v41, %v1019_v42 }
  0xae   :  { %v1023_v43 = vpop.f32.mrf.mxu0 }
  0xaf   :  { %v1025_v44 = vpop.f32.mrf.mxu1 }
  0xb0 LB: > { %221 = vmatpush.msra.mxu0 %v904_v9  ;;  %244 = vmatpush.msra.mxu1 %v884_v5  ;;  %s521_s9 = sshll.u32 %s740_s5, 1  ;;  %v253_v46 = vperm.slane %v909_v10, 0  ;;  %s751_s12 = smov 64   ;;  %v298_v37 = vperm.slane %v922_v15, 0  ;;  %vm350_vm6 = vcmask 1041409   ;;  %vm354_vm7 = vcmask 58368   ;;  %s740_s5 = sphi %s1031_s5, %s200_s5   ;;  %v736_v31 = vphi %v193_v31, %v480_v31   ;;  %v732_v32 = vphi %v194_v32, %v1078_v32  }
  0xb1   : > { %317 = vmatpush.msra.mxu2 %v917_v14  ;;  %430 = vmatpush.msra.mxu3 %v967_v24  ;;  %s204_s4 = scalar_lea.vmem [#allocation2], %s521_s9  ;;  %s752_s0 = smov 32   ;;  %vm418_vm12 = vcmask 523264  }
  0xb2   : > { %222 = vmatpush.msra.mxu0 %v899_v8  ;;  %245 = vmatpush.msra.mxu1 %v879_v4  ;;  %v205_v45 = vld [vmem:[%s204_s4] sm:$0x3]  ;;  %s753_s30 = smov 96   ;;  %s476_s27 = scalar_lea.vmem [#allocation10], %s521_s9 }
  0xb3   : > { %318 = vmatpush.msra.mxu2 %v915_v13  ;;  %431 = vmatpush.msra.mxu3 %v962_v23 }
  0xb4   : > { %223 = vmatpush.msra.mxu0 %v894_v7  ;;  %246 = vmatpush.msra.mxu1 %v874_v3 }
  0xb5   : > { %319 = vmatpush.msra.mxu2 %v913_v12  ;;  %432 = vmatpush.msra.mxu3 %v957_v22 }
  0xb6   : > { %224 = vmatpush.msra.mxu0 %v889_v6  ;;  %247 = vmatpush.msra.mxu1 %v869_v2 }
  0xb7   : > { %522 = vmatmul.msk.f32.vlgmr.msra.gmra.mxu0 %vm126_vm0, %v736_v31  ;;  %523 = vmatmul.msk.f32.vlgmr.msra.gmra.mxu1 %vm126_vm0, %v205_v45 }
  0xb8   : > { %320 = vmatpush.msra.mxu2 %v911_v11  ;;  %433 = vmatpush.msra.mxu3 %v952_v21 }
  0xb9   : > { %460 = vmatpush.msrb.mxu0 %v980_v29 }
  0xba   : > { %434 = vmatpush.msra.mxu3 %v947_v20 }
  0xbb   : > { %461 = vmatpush.msrb.mxu0 %v978_v28 }
  0xbc   : > { %435 = vmatpush.msra.mxu3 %v942_v19 }
  0xbd   : > { %462 = vmatpush.msrb.mxu0 %v976_v27 }
  0xbe   : > { %436 = vmatpush.msra.mxu3 %v937_v18 }
  0xbf   : > { %463 = vmatpush.msrb.mxu0 %v974_v26 }
  0xc0   : > { %437 = vmatpush.msra.mxu3 %v932_v17 }
 0x134   : > { %v226_v47 = vpop.f32.mrf.mxu0  ;;  %v249_v48 = vpop.f32.mrf.mxu1 }
 0x135   : > { %v250_v49 = vadd.f32 %v249_v48, %v226_v47 }
 0x137   : > { %v255_v50 = vadd.f32 %v253_v46, %v250_v49 }
 0x139   : > { %574 = vtanh.f32 %v255_v50  ;;  %v524_v52 = vmul.f32 -1.442695, %v255_v50 }
 0x13b   : > { %576 = vpow2.f32 %v524_v52  ;;  %v336_v52 = vperm.slane %v927_v16, 0 }
 0x13f   : > { %v575_v51 = vpop.eup %574 }
 0x140   : > { %282 = vrot.lane.b32.xlu0 %v575_v51, %s751_s12 }
 0x141   : > { %v577_v53 = vpop.eup %576 }
 0x142   : > { %v259_v54 = vadd.f32 1.0, %v577_v53 }
 0x144   : > { %578 = vrcp.f32 %v259_v54  ;;  %v271_v60 = vand.u32 2147483648, %v259_v54  ;;  %vm265_vm3 = vweird.f32 %v259_v54  ;;  %v269_v61 = vand.u32 2147483647, %v259_v54 }
 0x146   : > { %v272_v63 = vor.u32 1.1754944e-38, %v271_v60  ;;  %vm270_vm5 = vcmp.eq.f32.partialorder %v269_v61, 8.507059e+37 }
 0x148   : > { %277 = vrot.lane.b32.xlu0 %v732_v32, %s752_s0 }
 0x14a   : > { %v579_v55 = vpop.eup %578 }
 0x14b   : > { %v261_v56 = vmul.f32 %v579_v55, %v259_v54  ;;  %vm266_vm2 = vweird.f32 %v579_v55 }
 0x14c   : > { %vm267_vm4 = vmor %vm265_vm3, %vm266_vm2 }
 0x14d   : > { %v262_v57 = vsub.f32 1.0, %v261_v56 }
 0x14f   : > { %v263_v58 = vmul.f32 %v579_v55, %v262_v57 }
 0x151   : > { %v264_v59 = vadd.f32 %v579_v55, %v263_v58 }
 0x153   : > { %v268_v62 = vsel %vm267_vm4, %v579_v55, %v264_v59 }
 0x154   : > { %v1070_v31 = vsel %vm270_vm5, %v272_v63, %v268_v62 }
 0x1b2   : > { %v283_v0 = vpop.permute.xlu0 %282 }
 0x1b3   : > { %v285_v32 = vmul.f32 %v283_v0, %v1070_v31 }
 0x1b5   : > { %287 = vrot.lane.b32.xlu1 %v285_v32, %s752_s0 }
 0x1ba   : > { %v278_v33 = vpop.permute.xlu0 %277 }
 0x1bb   : > { %v280_v34 = vmul.f32 %v278_v33, %v1070_v31 }
 0x227   : > { %v288_v35 = vpop.permute.xlu1 %287 }
 0x228   : > { %v1075_v36 = vadd.f32 %v288_v35, %v280_v34 }
 0x22a   : > { %301 = vrot.lane.b32.xlu1 %v1075_v36, %s753_s30 }
 0x29c   : > { %v1078_v32 = vpop.permute.xlu1 %301  }
 0x29d   : > { %525 = vmatmul.msk.f32.vlgmr.msra.gmra.mxu2 %vm126_vm0, %v1078_v32 }
 0x320   : > { %v322_v45 = vpop.f32.mrf.mxu2 }
 0x321   : > { %v323_v46 = vadd.f32 %v322_v45, %v298_v37 }
 0x323   : > { %v326_v47 = vrot.slane %v323_v46, 1  ;;  %v327_v48 = vperm.slane %v323_v46, 0 }
 0x325   : > { %v328_v49 = vperm.slane %v326_v47, 0  ;;  %v331_v50 = vadd.f32 %v327_v48, %v1023_v43  ;;  %v382_v48 = vshrl.u32 %v156_v40, 7 }
 0x327   : > { %v332_v51 = vadd.f32 %v328_v49, %v1025_v44  ;;  %580 = vtanh.f32 %v331_v50  ;;  %571 = vset.pattern.permute.xlu2 %v382_v48 }
 0x329   : > { %582 = vtanh.f32 %v332_v51 }
 0x32d   : > { %v581_v53 = vpop.eup %580 }
 0x32e   : > { %v338_v54 = vmul.f32 %v581_v53, %v336_v52 }
 0x32f   : > { %v583_v56 = vpop.eup %582 }
 0x330   : > { %v340_v55 = vsel %vm126_vm0, %v338_v54, 0.0  ;;  %v339_v57 = vmul.f32 %v583_v56, %v336_v52 }
 0x331   : > { %341 = vadd.xlane.f32.xlu2 %v340_v55 }
 0x332   : > { %v343_v58 = vsel %vm126_vm0, %v339_v57, 0.0 }
 0x339   : > { %344 = vadd.xlane.f32.xlu2 %v343_v58 }
 0x3a4   : > { %v342_v59 = vpop.xlane.xlu2 %341 }
 0x3a5   : > { %v348_v61 = vperm.slane %v342_v59, %v1017_v41 }
 0x3ac   : > { %v345_v60 = vpop.xlane.xlu2 %344 }
 0x3ad   : > { %v349_v62 = vperm.slane %v345_v60, %v1017_v41 }
 0x3af   : > { %v351_v63 = vsel %vm350_vm6, %v349_v62, %v348_v61 }
 0x3b0   : > { %v353_v0 = vsel %vm162_vm1, %v351_v63, -1e+30 }
 0x3b1   : > { %v355_v33 = vsel %vm354_vm7, %v353_v0, -inf }
 0x3b2   : > { %356 = vmax.xlane.f32.xlu0 %v355_v33 }
 0x425   : > { %v357_v34 = vpop.xlane.xlu0 %356 }
 0x426   : > { %v358_v35 = vsub.f32 %v353_v0, %v357_v34 }
 0x428   : > { %v359_v37 = vmul.f32 1.442695, %v358_v35 }
 0x42a   : > { %584 = vpow2.f32 %v359_v37 }
 0x430   : > { %v585_v45 = vpop.eup %584 }
 0x431   : > { %v361_v46 = vsel %vm162_vm1, %v585_v45, 0.0 }
 0x432   : > { %v362_v47 = vsel %vm354_vm7, %v361_v46, 0.0 }
 0x433   : > { %363 = vadd.xlane.f32.xlu1 %v362_v47 }
 0x4a6   : > { %v364_v49 = vpop.xlane.xlu1 %363 }
 0x4a7   : > { %586 = vrcp.f32 %v364_v49  ;;  %v376_v53 = vand.u32 2147483648, %v364_v49  ;;  %v374_v55 = vand.u32 2147483647, %v364_v49  ;;  %vm370_vm9 = vweird.f32 %v364_v49 }
 0x4a8   : > { %588 = vtanh.f32 %v1075_v36 }
 0x4a9   : > { %v377_v57 = vor.u32 1.1754944e-38, %v376_v53  ;;  %vm375_vm11 = vcmp.eq.f32.partialorder %v374_v55, 8.507059e+37 }
 0x4ad   : > { %v587_v50 = vpop.eup %586 }
 0x4ae   : > { %v366_v51 = vmul.f32 %v587_v50, %v364_v49  ;;  %vm371_vm8 = vweird.f32 %v587_v50  ;;  %v589_v63 = vpop.eup %588 }
 0x4af   : > { %vm372_vm10 = vmor %vm370_vm9, %vm371_vm8 }
 0x4b0   : > { %v367_v52 = vsub.f32 1.0, %v366_v51 }
 0x4b2   : > { %v368_v54 = vmul.f32 %v587_v50, %v367_v52 }
 0x4b4   : > { %v369_v56 = vadd.f32 %v587_v50, %v368_v54 }
 0x4b6   : > { %v373_v58 = vsel %vm372_vm10, %v587_v50, %v369_v56 }
 0x4b7   : > { %v378_v59 = vsel %vm375_vm11, %v377_v57, %v373_v58 }
 0x4b8   : > { %v379_v60 = vmul.f32 %v378_v59, %v361_v46 }
 0x4ba   : > { %v380_v61 = vperm.slane %v379_v60, 0  ;;  %v387_v62 = vperm.slane %v379_v60, 1 }
 0x4bc   : > { %385 = vperm.xlu2 %571, %v380_v61  }
 0x4c4   : > { %392 = vperm.xlu2 %571, %v387_v62   ;;  %v468_v62 = vstv %s740_s5  ;;  %s200_s5 = sadd.s32 1, %s740_s5  }
 0x4c5   : > { %vm469_vm13 = vcmp.lt.s32.totalorder %v468_v62, %v864_v1  ;;  %p197_p0 = scmp.ge.s32.totalorder %s200_s5, 8  }
 0x4c6   :  { %s1153_s21 = sld [smem:[#allocation17_spill]] (%p197_p0)  ;;  %s755_s6 = smov (%p197_p0), [#allocation10]  }
 0x4c7   :  { %s487_s19 = sshll.u32 (%p197_p0), %s755_s6, 4  ;;  %s488_s19 = int_to_ptr.vmem [resolvable:$true] %s487_s19 }
 0x4cc   : > { %293 = vrot.lane.b32.xlu2 %v589_v63, %s751_s12  ;;  %v754_v63 = vmov 0   ;;  %s489_s10 = sshll.u32 (%p197_p0), %s1153_s21, 4  ;;  %s490_s10 = int_to_ptr.hbm [resolvable:$true] %s489_s10 }
 0x4cd   : > { %572 = vset.pattern.permute.xlu2 %v754_v63  ;;  %573 = vset.pattern.permute.xlu0 %v754_v63 }
 0x516   : > { %v386_v0 = vpop.permute.xlu2 %385 }
 0x517   : > { %v394_v33 = vmul.f32 %v386_v0, %v1008_v38  ;;  %v416_v0 = vperm.slane %v972_v25, 0 }
 0x519   : > { %v396_v34 = vsel %vm126_vm0, %v394_v33, 0.0 }
 0x51a   : > { %v397_v35 = vrot.slane %v396_v34, 4 }
 0x51c   : > { %v398_v37 = vadd.f32 %v397_v35, %v396_v34  ;;  %v443_v35 = vperm.slane %v985_v30, 0 }
 0x51e   : > { %v393_v45 = vpop.permute.xlu2 %392  ;;  %v399_v46 = vrot.slane %v398_v37, 2 }
 0x51f   : > { %v395_v47 = vmul.f32 %v393_v45, %v1010_v39 }
 0x520   : > { %v400_v50 = vadd.f32 %v399_v46, %v398_v37 }
 0x521   : > { %v403_v48 = vsel %vm126_vm0, %v395_v47, 0.0 }
 0x522   : > { %v404_v49 = vrot.slane %v403_v48, 4  ;;  %v401_v55 = vrot.slane %v400_v50, 1 }
 0x524   : > { %v405_v51 = vadd.f32 %v404_v49, %v403_v48  ;;  %v402_v58 = vadd.f32 %v401_v55, %v400_v50 }
 0x526   : > { %v406_v52 = vrot.slane %v405_v51, 2  ;;  %v294_v53 = vpop.permute.xlu2 %293 }
 0x527   : > { %v296_v54 = vmul.f32 %v294_v53, %v1070_v31  ;;  %v470_v31 = vsel %vm469_vm13, 1, %v754_v63 }
 0x528   : > { %v407_v56 = vadd.f32 %v406_v52, %v405_v51  ;;  %472 = vperm.xlu2 %572, %v470_v31  }
 0x529   : > { %479 = vrot.lane.b32.xlu0 %v296_v54, %s752_s0 }
 0x52a   : > { %v408_v57 = vrot.slane %v407_v56, 1 }
 0x52c   : > { %v409_v59 = vadd.f32 %v408_v57, %v407_v56 }
 0x52e   : > { %v412_v60 = vsel %vm350_vm6, %v409_v59, %v402_v58 }
 0x52f   : > { %v414_v61 = vsel %vm126_vm0, %v412_v60, %v1075_v36 }
 0x530   : > { %526 = vmatmul.msk.f32.vlgmr.msra.gmra.mxu3 %vm418_vm12, %v414_v61 }
 0x582   : > { %v473_v36 = vpop.permute.xlu2 %472 }
 0x583   : > { %vm474_vm14 = vcmp.eq.s32.totalorder %v473_v36, 1 }
 0x59b   : > { %v480_v31 = vpop.permute.xlu0 %479  }
 0x5b3   : > { %v439_v33 = vpop.f32.mrf.mxu3 }
 0x5b4   : > { %v440_v34 = vadd.f32 %v439_v33, %v416_v0 }
 0x5b6   : > { %527 = vmatmul.msk.f32.vlgmr.msrb.gmra.mxu0 %vm126_vm0, %v440_v34 }
 0x633   : > { %v465_v37 = vpop.f32.mrf.mxu0  ;;  %199 = sbr.rel (!%p197_p0) target bundleno = 176 (0xb0), region = 113 }
 0x634   : > { %v466_v45 = vadd.f32 %v465_v37, %v443_v35 }
 0x636   : > { %v475_v47 = vsel %vm474_vm14, %v466_v45, 0.0 }
 0x637   : > { %477 = vst [vmem:[%s476_s27] sm:$0x3] %v475_v47 }
 0x638   :  { %495 = dma.vmem_to_hbm [thread:$0]  %s488_s19, 256, %s490_s10, [#allocation4], %s746_s23, %s746_s23, %s747_s17  }
 0x639   :  { %728 = dma.done.wait [#allocation4], 256  }
 0x63a   :  { %729 = vsyncadd [#allocation4], 4294967040 }
 0x63b   :  { %500 = vsyncpa [#allocation3], 1 }
 0x63c   :  { %501 = vsyncpa [#allocation6], 1 }
 0x63d   :  { %502 = vsyncpa [#allocation9], 1 }
 0x63e   :  { %503 = vsyncpa [#allocation4], 1 }

</bundles_post_ra>
